<compile_context>
chip_gen: v5e
topology: v5e:2x2
jax: 0.10.0
libtpu: 0.0.40
codegen_flags: <defaults>
</compile_context>

<pallas_src>
import jax
import jax.numpy as jnp
from jax.experimental import pallas as pl
from jax.experimental.pallas import tpu as pltpu


def toy3_fused_kernel(x_ref, w_ref, b_ref, o_ref):
    """One fused affine layer, computed entirely on the VPU (no MXU)."""
    x = x_ref[...]   # (tile_b, 3) f32
    w = w_ref[...]   # (3, 3)      f32, layout (in, out)
    b = b_ref[...]   # (1, 3)      f32
    # K = N = 3: three broadcast multiply-adds + bias. Stays in f32 throughout.
    acc = (b
           + x[:, 0:1] * w[0:1, :]
           + x[:, 1:2] * w[1:2, :]
           + x[:, 2:3] * w[2:3, :])
    o_ref[...] = acc.astype(o_ref.dtype)


def _compose_layers(params):
    """Exactly fold the three affine layers into one (W, b) pair (plain jnp)."""
    w = params["w1"] @ params["w2"] @ params["w3"]
    b = (params["b1"] @ params["w2"] + params["b2"]) @ params["w3"] + params["b3"]
    return w, b


# Below this batch size the Pallas call is pure launch overhead; use fused XLA.
_SMALL_BATCH = 4096
# 131072 rows * 3 * f32 = 1.5 MiB/block; double-buffered in+out = 6 MiB total:
# safely inside the 16 MiB v5e scoped-VMEM default and past the ~1 MiB knee
# of the measured HBM roofline on v6e/v7x.
_TILE_CAP_ROWS = 131072
# Keep >= 8 grid steps for large B so the "parallel" axis can use both v7x TCs.
_TARGET_STEPS = 8


def toy_model3_forward(x, params, *, tile_b=None, force_pallas=False):
    """x: (B, 3) float32. params: dict of w1,b1,w2,b2,w3,b3 (weights (in, out))."""
    B, F = x.shape
    w, b = _compose_layers(params)  # plain jnp, outside the kernel

    if not force_pallas and B < _SMALL_BATCH:
        # Tiny problem: a single fused XLA affine is strictly faster than a
        # kernel launch (per review).
        return x @ w + b

    if tile_b is None:
        tile_b = min(_TILE_CAP_ROWS, pl.cdiv(B, _TARGET_STEPS))
        tile_b = max(8, pl.cdiv(tile_b, 8) * 8)  # f32 sublane multiple

    # No host-side padding: Pallas masks writes of the partial tail block.
    grid = (pl.cdiv(B, tile_b),)

    return pl.pallas_call(
        toy3_fused_kernel,
        out_shape=jax.ShapeDtypeStruct((B, F), jnp.float32),
        grid=grid,
        in_specs=[
            # x: tiled over batch.
            pl.BlockSpec((tile_b, F), lambda i: (i, 0)),
            # Composed weight / bias: same block every step -> VMEM-resident.
            pl.BlockSpec((F, F), lambda i: (0, 0)),
            pl.BlockSpec((1, F), lambda i: (0, 0)),
        ],
        out_specs=pl.BlockSpec((tile_b, F), lambda i: (i, 0)),
        compiler_params=pltpu.CompilerParams(
            dimension_semantics=("parallel",),  # shard batch across TCs on v7x
        ),
    )(x, w, b)


def init_params(key, in_features=3, out_features=3):
    """Deterministic init mimicking torch.nn.Linear default (uniform +/- 1/sqrt(fan_in))."""
    bound = 1.0 / jnp.sqrt(jnp.float32(in_features))
    keys = jax.random.split(key, 6)
    uni = lambda k, shape: jax.random.uniform(
        k, shape, dtype=jnp.float32, minval=-bound, maxval=bound
    )
    # Weights stored as (in, out): kernel computes x @ W == PyTorch x @ W_pt^T.
    return {
        "w1": uni(keys[0], (in_features, out_features)),
        "b1": uni(keys[1], (1, out_features)),
        "w2": uni(keys[2], (in_features, out_features)),
        "b2": uni(keys[3], (1, out_features)),
        "w3": uni(keys[4], (in_features, out_features)),
        "b3": uni(keys[5], (1, out_features)),
    }


if __name__ == "__main__":
    key = jax.random.PRNGKey(0)
    k_params, k_x1, k_x2 = jax.random.split(key, 3)

    params = init_params(k_params)

    def ref_forward(x):
        out = x
        for i in (1, 2, 3):
            out = out @ params[f"w{i}"] + params[f"b{i}"]
        return out

    # 1) Small batch forced through the Pallas kernel (grid = 1 step).
    x1 = jax.random.normal(k_x1, (8, 3), dtype=jnp.float32)
    out1 = jax.block_until_ready(toy_model3_forward(x1, params, force_pallas=True))
    assert out1.shape == (8, 3)
    assert jnp.allclose(out1, ref_forward(x1), atol=1e-5), "mismatch (pallas, B=8)"

    # 2) Batch not divisible by the tile: exercises the masked partial tail
    #    block (no host-side pad / slice).
    x2 = jax.random.normal(k_x2, (13, 3), dtype=jnp.float32)
    out2 = jax.block_until_ready(
        toy_model3_forward(x2, params, tile_b=8, force_pallas=True)
    )
    assert out2.shape == (13, 3)
    assert jnp.allclose(out2, ref_forward(x2), atol=1e-5), "mismatch (pallas, B=13)"

    # 3) Default small-batch fast path (fused XLA affine, no kernel launch).
    out3 = jax.block_until_ready(toy_model3_forward(x1, params))
    assert jnp.allclose(out3, ref_forward(x1), atol=1e-5), "mismatch (fast path)"

    print("KERNEL_OK")
</pallas_src>

<mosaic_0001>
module attributes {stable_mosaic.version = 11 : i64} {
  func.func @toy3_fused_kernel(%arg0: i32, %arg1: memref<8x3xf32, #tpu.memory_space<vmem>>, %arg2: memref<3x3xf32, #tpu.memory_space<vmem>>, %arg3: memref<1x3xf32, #tpu.memory_space<vmem>>, %arg4: memref<8x3xf32, #tpu.memory_space<vmem>>) attributes {dimension_semantics = [#tpu.dimension_semantics<parallel>], iteration_bounds = array<i64: 1>, scalar_prefetch = 0 : i64, scratch_operands = 0 : i64, tpu.core_type = #tpu.core_type<tc>, window_params = [{transform_indices = @transform_0, window_bounds = array<i64: 8, 3>}, {pipeline_mode = #tpu.pipeline_mode<synchronous>, transform_indices = @transform_1, window_bounds = array<i64: 3, 3>}, {pipeline_mode = #tpu.pipeline_mode<synchronous>, transform_indices = @transform_2, window_bounds = array<i64: 1, 3>}, {transform_indices = @transform_3, window_bounds = array<i64: 8, 3>}]} {
    %c0 = arith.constant 0 : index
    %c0_0 = arith.constant 0 : index
    %0 = vector.load %arg1[%c0, %c0_0] : memref<8x3xf32, #tpu.memory_space<vmem>>, vector<8x3xf32>
    %c0_1 = arith.constant 0 : index
    %c0_2 = arith.constant 0 : index
    %1 = vector.load %arg2[%c0_1, %c0_2] : memref<3x3xf32, #tpu.memory_space<vmem>>, vector<3x3xf32>
    %c0_3 = arith.constant 0 : index
    %c0_4 = arith.constant 0 : index
    %2 = vector.load %arg3[%c0_3, %c0_4] : memref<1x3xf32, #tpu.memory_space<vmem>>, vector<1x3xf32>
    %3 = vector.extract_strided_slice %0 {offsets = [0, 0], sizes = [8, 1], strides = [1, 1]} : vector<8x3xf32> to vector<8x1xf32>
    %4 = vector.extract_strided_slice %1 {offsets = [0, 0], sizes = [1, 3], strides = [1, 1]} : vector<3x3xf32> to vector<1x3xf32>
    %5 = vector.broadcast %3 : vector<8x1xf32> to vector<8x3xf32>
    %6 = vector.broadcast %4 : vector<1x3xf32> to vector<8x3xf32>
    %7 = arith.mulf %5, %6 : vector<8x3xf32>
    %8 = vector.broadcast %2 : vector<1x3xf32> to vector<8x3xf32>
    %9 = arith.addf %8, %7 : vector<8x3xf32>
    %10 = vector.extract_strided_slice %0 {offsets = [0, 1], sizes = [8, 1], strides = [1, 1]} : vector<8x3xf32> to vector<8x1xf32>
    %11 = vector.extract_strided_slice %1 {offsets = [1, 0], sizes = [1, 3], strides = [1, 1]} : vector<3x3xf32> to vector<1x3xf32>
    %12 = vector.broadcast %10 : vector<8x1xf32> to vector<8x3xf32>
    %13 = vector.broadcast %11 : vector<1x3xf32> to vector<8x3xf32>
    %14 = arith.mulf %12, %13 : vector<8x3xf32>
    %15 = arith.addf %9, %14 : vector<8x3xf32>
    %16 = vector.extract_strided_slice %0 {offsets = [0, 2], sizes = [8, 1], strides = [1, 1]} : vector<8x3xf32> to vector<8x1xf32>
    %17 = vector.extract_strided_slice %1 {offsets = [2, 0], sizes = [1, 3], strides = [1, 1]} : vector<3x3xf32> to vector<1x3xf32>
    %18 = vector.broadcast %16 : vector<8x1xf32> to vector<8x3xf32>
    %19 = vector.broadcast %17 : vector<1x3xf32> to vector<8x3xf32>
    %20 = arith.mulf %18, %19 : vector<8x3xf32>
    %21 = arith.addf %15, %20 : vector<8x3xf32>
    %c0_5 = arith.constant 0 : index
    %c0_6 = arith.constant 0 : index
    %22 = vector.load %arg4[%c0_5, %c0_6] : memref<8x3xf32, #tpu.memory_space<vmem>>, vector<8x3xf32>
    tpu.vector_store %arg4[%c0_5, %c0_6], %21 {strides = array<i32>} : memref<8x3xf32, #tpu.memory_space<vmem>>, vector<8x3xf32>,
    return
  }
  func.func @transform_0(%arg0: i32) -> (i32, i32) {
    %c0_i32 = arith.constant 0 : i32
    %c0_i32_0 = arith.constant 0 : i32
    return %arg0, %c0_i32 : i32, i32
  }
  func.func @transform_1(%arg0: i32) -> (i32, i32) {
    %c0_i32 = arith.constant 0 : i32
    %c0_i32_0 = arith.constant 0 : i32
    %c0_i32_1 = arith.constant 0 : i32
    return %c0_i32, %c0_i32_0 : i32, i32
  }
  func.func @transform_2(%arg0: i32) -> (i32, i32) {
    %c0_i32 = arith.constant 0 : i32
    %c0_i32_0 = arith.constant 0 : i32
    %c0_i32_1 = arith.constant 0 : i32
    return %c0_i32, %c0_i32_0 : i32, i32
  }
  func.func @transform_3(%arg0: i32) -> (i32, i32) {
    %c0_i32 = arith.constant 0 : i32
    %c0_i32_0 = arith.constant 0 : i32
    return %arg0, %c0_i32 : i32, i32
  }
}

</mosaic_0001>

<bundles_post_ra>
// kernel: tpu_custom_call.1
= control target key start
LH: loop header
LB: loop body
LE: loop exit
PB: predicated region body
PF: predicated region fallthrough
CT: control target
= control target key end

     0   :  { %v56_v0 = vmov 0   ;;  %v57_v2 = vmov 2   ;;  %v58_v3 = vmov 1   ;;  %vm42_vm0 = vcmask 23552   ;;  %s91_s0 = inlined_call_operand.vmem [shape: f32[8,3], index: 0, kind: input, shape index: {}]   ;;  %s92_s2 = inlined_call_operand.vmem [shape: f32[1,3], index: 2, kind: input, shape index: {}]   ;;  %s93_s1 = inlined_call_operand.vmem [shape: f32[3,3], index: 1, kind: input, shape index: {}]   ;;  %s94_s3 = inlined_call_operand.vmem [shape: f32[8,3], index: 3, kind: output, shape index: {}]  }
   0x1   :  { %51 = vset.pattern.permute.xlu0 %v56_v0  ;;  %v14_v1 = vld [vmem:[%s91_s0] sm:$0xff]  ;;  %53 = vset.pattern.permute.xlu1 %v57_v2 }
   0x2   :  { %19 = vperm.xlu0 %51, %v14_v1   ;;  %36 = vperm.xlu1 %53, %v14_v1   ;;  %v15_v4 = vld [vmem:[%s93_s1] sm:$0x7] }
   0x3   :  { %v22_v6 = vperm.slane %v15_v4, 0  ;;  %v55_v7 = vld [vmem:[%s92_s2] ss:$0 sm:$0xff]  ;;  %v32_v9 = vperm.slane %v15_v4, 1  ;;  %v39_v10 = vperm.slane %v15_v4, 2 }
   0xa   :  { %52 = vset.pattern.permute.xlu0 %v58_v3 }
   0xb   :  { %29 = vperm.xlu0 %52, %v14_v1  }
  0x13   :  { %54 = vset.pattern.permute.xlu0 %v57_v2 }
  0x74   :  { %v20_v5 = vpop.permute.xlu0 %19  ;;  %v37_v11 = vpop.permute.xlu1 %36 }
  0x75   :  { %v23_v8 = vmul.f32 %v22_v6, %v20_v5  ;;  %v40_v15 = vmul.f32 %v39_v10, %v37_v11 }
  0x77   :  { %v27_v13 = vadd.f32 %v55_v7, %v23_v8 }
  0x7d   :  { %v30_v12 = vpop.permute.xlu0 %29 }
  0x7e   :  { %v33_v14 = vmul.f32 %v32_v9, %v30_v12 }
  0x80   :  { %v34_v16 = vadd.f32 %v33_v14, %v27_v13 }
  0x82   :  { %v41_v17 = vadd.f32 %v40_v15, %v34_v16 }
  0x84   :  { %43 = vst.msk [vmem:[%s94_s3] sm:$0xff] %vm42_vm0, %v41_v17 }

</bundles_post_ra>
